<compile_context>
chip_gen: v7x
topology: tpu7x:2x2x1
jax: 0.10.0
libtpu: 0.0.40
codegen_flags: <defaults>
</compile_context>

<pallas_src>
import numpy as np
import jax
import jax.numpy as jnp
from jax import lax
from jax.experimental import pallas as pl
from jax.experimental.pallas import tpu as pltpu

# ----- small synthetic config (resnet50's 2048-d features scaled down) -----
N_BATCH = 4        # per-view batch size  (2N = 8 rows -> sublane aligned)
C_IN = 4
H = W = 16
FEAT = 32          # stand-in "boneout_feature" (2048 for real resnet50)
HIDDEN = FEAT      # projection_MLP: hidden_dim = in_dim
OUT_DIM = 16       # projector out_dim (2048 in the original config)
TEMPERATURE = 0.07

LANE = 128


def _round_up(v, m):
  return ((v + m - 1) // m) * m


FEAT_P = _round_up(FEAT, LANE)     # 128
HID_P = _round_up(HIDDEN, LANE)    # 128
OUT_P = _round_up(OUT_DIM, LANE)   # 128


# --------------------------- fused kernel -----------------------------------
def simclr_fused_kernel(gap_ref, wstem_ref, bstem_ref, w1_ref, b1_ref,
                        w2_ref, b2_ref, stats_ref):
  """Backbone stand-in stem + projection_MLP + contrastive loss, one call."""
  # TODO(synk): the real ResNet50 backbone is eval()'d from external code in
  # the reference module; it is replaced here by avg-pool (hoisted to the
  # wrapper) + a linear stem.
  gap = gap_ref[...]                                        # (2N, C) f32

  # stem: bf16 MXU inputs, f32 accumulation (v5e-friendly)  -> (2N, FEAT_P)
  feats = jnp.maximum(
      jnp.dot(gap.astype(jnp.bfloat16), wstem_ref[...],
              preferred_element_type=jnp.float32) + bstem_ref[...], 0.0)

  # projection_MLP: bf16 MXU inputs, f32 accumulation, f32 elementwise.
  h = jnp.maximum(
      jnp.dot(feats.astype(jnp.bfloat16), w1_ref[...],
              preferred_element_type=jnp.float32) + b1_ref[...], 0.0)
  z = jnp.dot(h.astype(jnp.bfloat16), w2_ref[...],
              preferred_element_type=jnp.float32) + b2_ref[...]   # (2N, OUT_P)

  # ---------------- contrastive loss (all f32) ----------------
  m = z.shape[0]            # 2N
  n = m // 2
  inv_t = 1.0 / TEMPERATURE

  # row normalization: single EUP rsqrt (F.normalize clamps the norm at 1e-12).
  ss = jnp.sum(z * z, axis=-1, keepdims=True)
  reps = z * lax.rsqrt(jnp.maximum(ss, 1e-24))     # padded lanes stay zero

  # cosine-similarity matrix; rows are unit-norm so it's reps @ reps^T.
  # Keep inputs f32: bf16 here could flip strict-'>' top-k tie-breaking.
  sim = lax.dot_general(reps, reps, (((1,), (1,)), ((), ())),
                        preferred_element_type=jnp.float32)   # (2N, 2N)

  row = lax.broadcasted_iota(jnp.int32, (m, m), 0)
  col = lax.broadcasted_iota(jnp.int32, (m, m), 1)
  self_mask = row == col
  pos_mask = col == ((row + n) % m)                       # positive pair location

  pos = jnp.sum(jnp.where(pos_mask, sim, 0.0), axis=-1, keepdims=True)  # (2N,1)

  # Cross-entropy with label 0: row i's logit set is sim[i, j]/T for j != i,
  # with the positive at index 0 -> logsumexp(masked row) - positive/T.
  neg_big = jnp.float32(-1e30)              # large finite negative (safer than -inf)
  logits = jnp.where(self_mask, neg_big, sim * inv_t)
  row_max = jnp.max(logits, axis=-1, keepdims=True)
  lse = row_max + jnp.log(
      jnp.sum(jnp.exp(logits - row_max), axis=-1, keepdims=True))
  per_row_loss = lse - pos * inv_t                        # (2N, 1)

  # top-k accuracy of label 0: ties resolve in favour of the positive because
  # it sits at index 0 in the reference's logits, so strict ">" gives its rank.
  greater = jnp.where(self_mask, 0.0, (sim > pos).astype(jnp.float32))
  rank = jnp.sum(greater, axis=-1, keepdims=True)         # (2N, 1)

  # Fused stat reduction: one (2N, LANE) slab, one cross-sublane reduce, one
  # lane-dense store.  lane 0 = per-row loss, lane k>=1 = (rank < 2k-1), so
  # lanes 1..3 give top-1/3/5; lanes >=4 are ignored by the wrapper.
  scol = lax.broadcasted_iota(jnp.int32, (m, LANE), 1)
  ks = (2 * scol - 1).astype(jnp.float32)                 # 1, 3, 5 at lanes 1..3
  hits = (rank < ks).astype(jnp.float32)
  stats_mat = jnp.where(scol == 0, per_row_loss, hits)
  stats_ref[...] = jnp.sum(stats_mat, axis=0, keepdims=True) * (1.0 / m)


# --------------------------- wrapper -----------------------------------------
def _pad2(a, rows, cols):
  return jnp.pad(a, ((0, rows - a.shape[0]), (0, cols - a.shape[1])))


def prepare_params(params):
  """Pad to lane-dense shapes + cast to bf16 ONCE (outside the per-step call)."""
  wstem, bstem, w1, b1, w2, b2 = params
  c = wstem.shape[0]
  return (
      _pad2(wstem, c, FEAT_P).astype(jnp.bfloat16),
      _pad2(bstem.astype(jnp.float32), 1, FEAT_P),
      _pad2(w1, FEAT_P, HID_P).astype(jnp.bfloat16),
      _pad2(b1.astype(jnp.float32), 1, HID_P),
      _pad2(w2, HID_P, OUT_P).astype(jnp.bfloat16),
      _pad2(b2.astype(jnp.float32), 1, OUT_P),
  )


def simclr_forward(x1, x2, prepared):
  """Single fused pallas_call for both views + loss."""
  wstem_p, bstem_p, w1_p, b1_p, w2_p, b2_p = prepared
  n, c, h, w = x1.shape
  m = 2 * n

  # Global-average-pool hoisted into XLA: the kernel only sees the (2N, C)
  # pooled features (no (2N, C, H*W) slab DMA, no in-kernel lane reduce).
  x = jnp.concatenate([x1, x2], axis=0).astype(jnp.float32)
  gap = jnp.mean(x.reshape(m, c, h * w), axis=-1)          # (2N, C) f32

  flops = 2 * m * (c * FEAT_P + FEAT_P * HID_P + HID_P * OUT_P + m * OUT_P)
  transcendentals = m * m + 2 * m                          # exp + log + rsqrt
  bytes_accessed = (gap.size * 4
                    + (wstem_p.size + w1_p.size + w2_p.size) * 2
                    + (bstem_p.size + b1_p.size + b2_p.size) * 4
                    + LANE * 4)

  stats = pl.pallas_call(
      simclr_fused_kernel,
      out_shape=jax.ShapeDtypeStruct((1, LANE), jnp.float32),
      in_specs=[pl.BlockSpec(memory_space=pltpu.MemorySpace.VMEM)] * 7,
      out_specs=pl.BlockSpec(memory_space=pltpu.MemorySpace.VMEM),
      cost_estimate=pl.CostEstimate(flops=flops,
                                    transcendentals=transcendentals,
                                    bytes_accessed=bytes_accessed),
  )(gap, wstem_p, bstem_p, w1_p, b1_p, w2_p, b2_p)
  return stats[0, 0], stats[0, 1], stats[0, 2], stats[0, 3]


# --------------------------- pure-JAX / numpy reference ----------------------
def _encode_ref(x_nchw, params):
  """Mirrors the kernel math (bf16-in / f32-acc GEMMs), unpadded."""
  wstem, bstem, w1, b1, w2, b2 = params
  n, c, h, w = x_nchw.shape
  gap = x_nchw.reshape(n, c, h * w).mean(-1)
  feats = jnp.maximum(
      jnp.dot(gap.astype(jnp.bfloat16), wstem.astype(jnp.bfloat16),
              preferred_element_type=jnp.float32) + bstem[0], 0.0)
  hid = jnp.maximum(
      jnp.dot(feats.astype(jnp.bfloat16), w1.astype(jnp.bfloat16),
              preferred_element_type=jnp.float32) + b1[0], 0.0)
  return jnp.dot(hid.astype(jnp.bfloat16), w2.astype(jnp.bfloat16),
                 preferred_element_type=jnp.float32) + b2[0]


def _contrastive_loss_ref(z1, z2, temperature=0.07):
  # literal transcription of the PyTorch contrastive_loss in numpy (float64)
  z1 = np.asarray(z1, np.float64)
  z2 = np.asarray(z2, np.float64)
  nm = lambda z: z / np.maximum(np.linalg.norm(z, axis=1, keepdims=True), 1e-12)
  z1, z2 = nm(z1), nm(z2)
  n = z1.shape[0]
  reps = np.concatenate([z1, z2], axis=0)
  sim = reps @ reps.T
  l_pos = np.diag(sim, n)
  r_pos = np.diag(sim, -n)
  positives = np.concatenate([l_pos, r_pos]).reshape(2 * n, 1)
  diag = np.eye(2 * n, dtype=bool)
  diag[n:, :n] = diag[:n, n:] = diag[:n, :n]
  negatives = sim[~diag].reshape(2 * n, -1)
  logits = np.concatenate([positives, negatives], axis=1) / temperature
  mx = logits.max(axis=1, keepdims=True)
  lse = mx[:, 0] + np.log(np.exp(logits - mx).sum(axis=1))
  loss = np.sum(lse - logits[:, 0]) / (2 * n)
  order = np.argsort(-logits, axis=1, kind="stable")
  rank0 = np.argmax(order == 0, axis=1)
  tops = [float(np.mean(rank0 < k)) for k in (1, 3, 5)]
  return float(loss), tops


# ------------------------------ main ------------------------------------------
if __name__ == "__main__":
  key = jax.random.PRNGKey(0)
  ks = jax.random.split(key, 8)

  x1 = jax.random.normal(ks[0], (N_BATCH, C_IN, H, W), jnp.float32)
  x2 = jax.random.normal(ks[1], (N_BATCH, C_IN, H, W), jnp.float32)

  # deterministic parameter init (backbone stand-in stem + projection_MLP)
  wstem = jax.random.normal(ks[2], (C_IN, FEAT), jnp.float32) * 0.2
  bstem = jax.random.normal(ks[3], (1, FEAT), jnp.float32) * 0.02
  w1 = jax.random.normal(ks[4], (FEAT, HIDDEN), jnp.float32) * 0.1
  b1 = jax.random.normal(ks[5], (1, HIDDEN), jnp.float32) * 0.02
  w2 = jax.random.normal(ks[6], (HIDDEN, OUT_DIM), jnp.float32) * 0.1
  b2 = jax.random.normal(ks[7], (1, OUT_DIM), jnp.float32) * 0.02
  params = (wstem, bstem, w1, b1, w2, b2)

  # pad + cast once; the per-step forward only does GAP + the fused kernel.
  prepared = prepare_params(params)
  forward = jax.jit(simclr_forward)

  loss, top1, top3, top5 = forward(x1, x2, prepared)
  loss = jax.block_until_ready(loss)

  # sanity check against a literal (PyTorch-semantics) reference
  z1_ref = _encode_ref(x1, params)
  z2_ref = _encode_ref(x2, params)
  ref_loss, ref_tops = _contrastive_loss_ref(z1_ref, z2_ref, TEMPERATURE)

  assert abs(float(loss) - ref_loss) < 5e-3, (float(loss), ref_loss)
  assert abs(float(top1) - ref_tops[0]) < 1e-5
  assert abs(float(top3) - ref_tops[1]) < 1e-5
  assert abs(float(top5) - ref_tops[2]) < 1e-5

  print("KERNEL_OK")
</pallas_src>

<mosaic_0001>
module attributes {stable_mosaic.version = 11 : i64} {
  func.func @simclr_fused_kernel(%arg0: memref<8x4xf32, #tpu.memory_space<vmem>>, %arg1: memref<4x128xbf16, #tpu.memory_space<vmem>>, %arg2: memref<1x128xf32, #tpu.memory_space<vmem>>, %arg3: memref<128x128xbf16, #tpu.memory_space<vmem>>, %arg4: memref<1x128xf32, #tpu.memory_space<vmem>>, %arg5: memref<128x128xbf16, #tpu.memory_space<vmem>>, %arg6: memref<1x128xf32, #tpu.memory_space<vmem>>, %arg7: memref<1x128xf32, #tpu.memory_space<vmem>>) attributes {dimension_semantics = [], scalar_prefetch = 0 : i64, scratch_operands = 0 : i64, tpu.core_type = #tpu.core_type<tc>} {
    %c0 = arith.constant 0 : index
    %c0_0 = arith.constant 0 : index
    %0 = vector.load %arg0[%c0, %c0_0] : memref<8x4xf32, #tpu.memory_space<vmem>>, vector<8x4xf32>
    %1 = arith.truncf %0 : vector<8x4xf32> to vector<8x4xbf16>
    %c0_1 = arith.constant 0 : index
    %c0_2 = arith.constant 0 : index
    %2 = vector.load %arg1[%c0_1, %c0_2] : memref<4x128xbf16, #tpu.memory_space<vmem>>, vector<4x128xbf16>
    %cst = arith.constant dense<0.000000e+00> : vector<8x128xf32>
    %3 = tpu.matmul %1, %2, %cst {dimension_numbers = #tpu.dot_dimension_numbers<[1], [0], [0], [1], [0, 0, 1, 1], [], []>} : vector<8x4xbf16>, vector<4x128xbf16>, vector<8x128xf32> -> vector<8x128xf32>
    %c0_3 = arith.constant 0 : index
    %c0_4 = arith.constant 0 : index
    %4 = vector.load %arg2[%c0_3, %c0_4] : memref<1x128xf32, #tpu.memory_space<vmem>>, vector<1x128xf32>
    %5 = vector.broadcast %4 : vector<1x128xf32> to vector<8x128xf32>
    %6 = arith.addf %3, %5 : vector<8x128xf32>
    %cst_5 = arith.constant 0.000000e+00 : f32
    %7 = vector.broadcast %cst_5 : f32 to vector<8x128xf32>
    %8 = arith.maximumf %6, %7 : vector<8x128xf32>
    %9 = arith.truncf %8 : vector<8x128xf32> to vector<8x128xbf16>
    %c0_6 = arith.constant 0 : index
    %c0_7 = arith.constant 0 : index
    %10 = vector.load %arg3[%c0_6, %c0_7] : memref<128x128xbf16, #tpu.memory_space<vmem>>, vector<128x128xbf16>
    %cst_8 = arith.constant dense<0.000000e+00> : vector<8x128xf32>
    %11 = tpu.matmul %9, %10, %cst_8 {dimension_numbers = #tpu.dot_dimension_numbers<[1], [0], [0], [1], [0, 0, 1, 1], [], []>} : vector<8x128xbf16>, vector<128x128xbf16>, vector<8x128xf32> -> vector<8x128xf32>
    %c0_9 = arith.constant 0 : index
    %c0_10 = arith.constant 0 : index
    %12 = vector.load %arg4[%c0_9, %c0_10] : memref<1x128xf32, #tpu.memory_space<vmem>>, vector<1x128xf32>
    %13 = vector.broadcast %12 : vector<1x128xf32> to vector<8x128xf32>
    %14 = arith.addf %11, %13 : vector<8x128xf32>
    %cst_11 = arith.constant 0.000000e+00 : f32
    %15 = vector.broadcast %cst_11 : f32 to vector<8x128xf32>
    %16 = arith.maximumf %14, %15 : vector<8x128xf32>
    %17 = arith.truncf %16 : vector<8x128xf32> to vector<8x128xbf16>
    %c0_12 = arith.constant 0 : index
    %c0_13 = arith.constant 0 : index
    %18 = vector.load %arg5[%c0_12, %c0_13] : memref<128x128xbf16, #tpu.memory_space<vmem>>, vector<128x128xbf16>
    %cst_14 = arith.constant dense<0.000000e+00> : vector<8x128xf32>
    %19 = tpu.matmul %17, %18, %cst_14 {dimension_numbers = #tpu.dot_dimension_numbers<[1], [0], [0], [1], [0, 0, 1, 1], [], []>} : vector<8x128xbf16>, vector<128x128xbf16>, vector<8x128xf32> -> vector<8x128xf32>
    %c0_15 = arith.constant 0 : index
    %c0_16 = arith.constant 0 : index
    %20 = vector.load %arg6[%c0_15, %c0_16] : memref<1x128xf32, #tpu.memory_space<vmem>>, vector<1x128xf32>
    %21 = vector.broadcast %20 : vector<1x128xf32> to vector<8x128xf32>
    %22 = arith.addf %19, %21 : vector<8x128xf32>
    %23 = arith.mulf %22, %22 : vector<8x128xf32>
    %cst_17 = arith.constant dense<0.000000e+00> : vector<8xf32>
    %24 = vector.multi_reduction <add>, %23, %cst_17 [1] : vector<8x128xf32> to vector<8xf32>
    %25 = vector.shape_cast %24 : vector<8xf32> to vector<8x1xf32>
    %cst_18 = arith.constant 1.000000e-24 : f32
    %26 = vector.broadcast %cst_18 : f32 to vector<8x1xf32>
    %27 = arith.maximumf %25, %26 : vector<8x1xf32>
    %28 = math.rsqrt %27 : vector<8x1xf32>
    %29 = vector.broadcast %28 : vector<8x1xf32> to vector<8x128xf32>
    %30 = arith.mulf %22, %29 : vector<8x128xf32>
    %cst_19 = arith.constant dense<0.000000e+00> : vector<8x8xf32>
    %31 = tpu.matmul %30, %30, %cst_19 {dimension_numbers = #tpu.dot_dimension_numbers<[1], [1], [0], [0], [0, 0, 1, 0], [], []>} : vector<8x128xf32>, vector<8x128xf32>, vector<8x8xf32> -> vector<8x8xf32>
    %32 = tpu.iota {dimensions = array<i32: 0>} : vector<8x8xi32>
    %33 = tpu.iota {dimensions = array<i32: 1>} : vector<8x8xi32>
    %34 = arith.cmpi eq, %32, %33 : vector<8x8xi32>
    %c4_i32 = arith.constant 4 : i32
    %35 = vector.broadcast %c4_i32 : i32 to vector<8x8xi32>
    %36 = arith.addi %32, %35 : vector<8x8xi32>
    %c8_i32 = arith.constant 8 : i32
    %c0_i32 = arith.constant 0 : i32
    %37 = arith.cmpi eq, %c8_i32, %c0_i32 : i32
    %c1_i32 = arith.constant 1 : i32
    %38 = arith.select %37, %c1_i32, %c8_i32 : i32
    %39 = vector.broadcast %38 : i32 to vector<8x8xi32>
    %40 = arith.remsi %36, %39 : vector<8x8xi32>
    %c0_i32_20 = arith.constant 0 : i32
    %41 = vector.broadcast %c0_i32_20 : i32 to vector<8x8xi32>
    %42 = arith.cmpi ne, %40, %41 : vector<8x8xi32>
    %c0_i32_21 = arith.constant 0 : i32
    %43 = vector.broadcast %c0_i32_21 : i32 to vector<8x8xi32>
    %44 = arith.cmpi slt, %40, %43 : vector<8x8xi32>
    %c0_i32_22 = arith.constant 0 : i32
    %45 = arith.cmpi slt, %38, %c0_i32_22 : i32
    %46 = vector.broadcast %45 : i1 to vector<8x8xi1>
    %47 = vector.broadcast %46 : vector<8x8xi1> to vector<8x8xi1>
    %48 = arith.xori %44, %47 : vector<8x8xi1>
    %49 = arith.andi %48, %42 : vector<8x8xi1>
    %50 = vector.broadcast %38 : i32 to vector<8x8xi32>
    %51 = arith.addi %40, %50 : vector<8x8xi32>
    %52 = arith.select %49, %51, %40 : vector<8x8xi1>, vector<8x8xi32>
    %53 = arith.cmpi eq, %33, %52 : vector<8x8xi32>
    %cst_23 = arith.constant 0.000000e+00 : f32
    %54 = vector.broadcast %cst_23 : f32 to vector<8x8xf32>
    %55 = arith.select %53, %31, %54 : vector<8x8xi1>, vector<8x8xf32>
    %cst_24 = arith.constant dense<0.000000e+00> : vector<8xf32>
    %56 = vector.multi_reduction <add>, %55, %cst_24 [1] : vector<8x8xf32> to vector<8xf32>
    %57 = vector.shape_cast %56 : vector<8xf32> to vector<8x1xf32>
    %cst_25 = arith.constant 14.2857141 : f32
    %58 = vector.broadcast %cst_25 : f32 to vector<8x8xf32>
    %59 = arith.mulf %31, %58 : vector<8x8xf32>
    %cst_26 = arith.constant -1.000000e+30 : f32
    %60 = vector.broadcast %cst_26 : f32 to vector<8x8xf32>
    %61 = arith.select %34, %60, %59 : vector<8x8xi1>, vector<8x8xf32>
    %cst_27 = arith.constant dense<0xFF800000> : vector<8xf32>
    %62 = vector.multi_reduction <maximumf>, %61, %cst_27 [1] : vector<8x8xf32> to vector<8xf32>
    %63 = vector.shape_cast %62 : vector<8xf32> to vector<8x1xf32>
    %64 = vector.broadcast %63 : vector<8x1xf32> to vector<8x8xf32>
    %65 = arith.subf %61, %64 : vector<8x8xf32>
    %66 = math.exp %65 : vector<8x8xf32>
    %cst_28 = arith.constant dense<0.000000e+00> : vector<8xf32>
    %67 = vector.multi_reduction <add>, %66, %cst_28 [1] : vector<8x8xf32> to vector<8xf32>
    %68 = vector.shape_cast %67 : vector<8xf32> to vector<8x1xf32>
    %69 = math.log %68 : vector<8x1xf32>
    %70 = arith.addf %63, %69 : vector<8x1xf32>
    %cst_29 = arith.constant 14.2857141 : f32
    %71 = vector.broadcast %cst_29 : f32 to vector<8x1xf32>
    %72 = arith.mulf %57, %71 : vector<8x1xf32>
    %73 = arith.subf %70, %72 : vector<8x1xf32>
    %74 = vector.broadcast %57 : vector<8x1xf32> to vector<8x8xf32>
    %75 = arith.cmpf ogt, %31, %74 : vector<8x8xf32>
    %76 = arith.extui %75 : vector<8x8xi1> to vector<8x8xi32>
    %77 = arith.sitofp %76 : vector<8x8xi32> to vector<8x8xf32>
    %cst_30 = arith.constant 0.000000e+00 : f32
    %78 = vector.broadcast %cst_30 : f32 to vector<8x8xf32>
    %79 = arith.select %34, %78, %77 : vector<8x8xi1>, vector<8x8xf32>
    %cst_31 = arith.constant dense<0.000000e+00> : vector<8xf32>
    %80 = vector.multi_reduction <add>, %79, %cst_31 [1] : vector<8x8xf32> to vector<8xf32>
    %81 = vector.shape_cast %80 : vector<8xf32> to vector<8x1xf32>
    %82 = tpu.iota {dimensions = array<i32: 1>} : vector<8x128xi32>
    %c2_i32 = arith.constant 2 : i32
    %83 = vector.broadcast %c2_i32 : i32 to vector<8x128xi32>
    %84 = arith.muli %83, %82 : vector<8x128xi32>
    %c1_i32_32 = arith.constant 1 : i32
    %85 = vector.broadcast %c1_i32_32 : i32 to vector<8x128xi32>
    %86 = arith.subi %84, %85 : vector<8x128xi32>
    %87 = arith.sitofp %86 : vector<8x128xi32> to vector<8x128xf32>
    %88 = vector.broadcast %81 : vector<8x1xf32> to vector<8x128xf32>
    %89 = arith.cmpf olt, %88, %87 : vector<8x128xf32>
    %90 = arith.extui %89 : vector<8x128xi1> to vector<8x128xi32>
    %91 = arith.sitofp %90 : vector<8x128xi32> to vector<8x128xf32>
    %c0_i32_33 = arith.constant 0 : i32
    %92 = vector.broadcast %c0_i32_33 : i32 to vector<8x128xi32>
    %93 = arith.cmpi eq, %82, %92 : vector<8x128xi32>
    %94 = vector.shape_cast %73 : vector<8x1xf32> to vector<8x1xf32>
    %95 = vector.broadcast %94 : vector<8x1xf32> to vector<8x128xf32>
    %96 = arith.select %93, %95, %91 : vector<8x128xi1>, vector<8x128xf32>
    %cst_34 = arith.constant dense<0.000000e+00> : vector<128xf32>
    %97 = vector.multi_reduction <add>, %96, %cst_34 [0] : vector<8x128xf32> to vector<128xf32>
    %98 = vector.shape_cast %97 : vector<128xf32> to vector<1x128xf32>
    %cst_35 = arith.constant 1.250000e-01 : f32
    %99 = vector.broadcast %cst_35 : f32 to vector<1x128xf32>
    %100 = arith.mulf %98, %99 : vector<1x128xf32>
    %c0_36 = arith.constant 0 : index
    %c0_37 = arith.constant 0 : index
    %101 = vector.load %arg7[%c0_36, %c0_37] : memref<1x128xf32, #tpu.memory_space<vmem>>, vector<1x128xf32>
    tpu.vector_store %arg7[%c0_36, %c0_37], %100 {strides = array<i32>} : memref<1x128xf32, #tpu.memory_space<vmem>>, vector<1x128xf32>,
    return
  }
}

</mosaic_0001>

<bundles_post_ra>
// kernel: simclr_forward.1
= control target key start
LH: loop header
LB: loop body
LE: loop exit
PB: predicated region body
PF: predicated region fallthrough
CT: control target
= control target key end

     0   :  { %vm41_vm0 = vcmask 1041408   ;;  %v574_v0 = vmov 0.0   ;;  %vm575_vm1 = vmmov 0   ;;  %vm37_vm2 = vcmask 31744   ;;  %s714_s1 = inlined_call_operand.vmem [shape: bf16[4,128], index: 1, kind: input, shape index: {}]   ;;  %s715_s0 = inlined_call_operand.vmem [shape: f32[8,4], index: 0, kind: input, shape index: {}]   ;;  %s716_s3 = inlined_call_operand.vmem [shape: bf16[128,128], index: 3, kind: input, shape index: {}]   ;;  %s717_s5 = inlined_call_operand.vmem [shape: bf16[128,128], index: 5, kind: input, shape index: {}]   ;;  %s718_s2 = inlined_call_operand.vmem [shape: f32[1,128], index: 2, kind: input, shape index: {}]   ;;  %s719_s4 = inlined_call_operand.vmem [shape: f32[1,128], index: 4, kind: input, shape index: {}]   ;;  %s720_s6 = inlined_call_operand.vmem [shape: f32[1,128], index: 6, kind: input, shape index: {}]   ;;  %s721_s7 = inlined_call_operand.vmem [shape: f32[1,128], index: 7, kind: output, shape index: {}]  }
   0x1   :  { %499 = vmatprep.subr.bf16.mxu0 %v574_v0  ;;  %v29_v1 = vld [vmem:[%s714_s1] sm:$0x3]  ;;  %501 = vmatprep.mubr.msk.bf16.mxu0 %vm575_vm1, %v574_v0  ;;  %v553_v6 = vld [vmem:[%s716_s3 + $0x8] sm:$0xff]   ;;  %v554_v7 = vld [vmem:[%s716_s3 + $0x10] sm:$0xff]   ;;  %v387_v48 = vlaneseq  ;;  %vm407_vm4 = vcmask 64512  }
   0x2   :  { %v27_v2 = vld [vmem:[%s715_s0] sm:$0xff]  ;;  %v43_v3 = vsel %vm41_vm0, %v29_v1, 0  ;;  %505 = vmatprep.subr.bf16.mxu1 %v574_v0  ;;  %521 = vmatprep.mubr.msk.bf16.mxu1 %vm575_vm1, %v574_v0  ;;  %v555_v8 = vld [vmem:[%s716_s3 + $0x18] sm:$0xff]   ;;  %v557_v10 = vld [vmem:[%s716_s3 + $0x28] sm:$0xff]  }
   0x3   :  { %v28_v4 = vpack.c.bf16 %v27_v2, %v27_v2  ;;  %v552_v5 = vld [vmem:[%s716_s3] sm:$0xff]   ;;  %500 = vmatpush3.bf16.msra.mxu0 %v43_v3  ;;  %v558_v11 = vld [vmem:[%s716_s3 + $0x30] sm:$0xff]   ;;  %v559_v12 = vld [vmem:[%s716_s3 + $0x38] sm:$0xff]   ;;  %v388_v49 = vshrl.u32 %v387_v48, 7  ;;  %v390_v51 = vand.u32 127, %v387_v48 }
   0x4   :  { %506 = vmatpush3.bf16.msra.mxu1 %v552_v5  ;;  %525 = vmatprep.subr.bf16.mxu0 %v574_v0  ;;  %v556_v9 = vld [vmem:[%s716_s3 + $0x20] sm:$0xff]   ;;  %v561_v14 = vld [vmem:[%s717_s5 + $0x8] sm:$0xff]   ;;  %v562_v15 = vld [vmem:[%s717_s5 + $0x10] sm:$0xff]  }
   0x5   :  { %507 = vmatprep.subr.bf16.mxu1 %v574_v0  ;;  %v560_v13 = vld [vmem:[%s717_s5] sm:$0xff]   ;;  %v563_v16 = vld [vmem:[%s717_s5 + $0x18] sm:$0xff]   ;;  %v565_v18 = vld [vmem:[%s717_s5 + $0x28] sm:$0xff]   ;;  %v392_v50 = vadd.s32 4, %v388_v49  ;;  %vm391_vm5 = vcmp.eq.s32.totalorder %v388_v49, %v390_v51  ;;  %vm440_vm8 = vcmp.eq.s32.totalorder %v390_v51, 0 }
   0x6   :  { %502 = vmatmul.mubr.msk.bf16.vlgmr.msra.gmra.mrb[0].mxu0 %vm37_vm2, %v28_v4  ;;  %v564_v17 = vld [vmem:[%s717_s5 + $0x20] sm:$0xff]   ;;  %v566_v27 = vld [vmem:[%s717_s5 + $0x30] sm:$0xff]   ;;  %v567_v28 = vld [vmem:[%s717_s5 + $0x38] sm:$0xff]  }
   0x7   :  { %541 = vmatprep.mubr.msk.bf16.mxu0 %vm575_vm1, %v574_v0  ;;  %526 = vmatpush3.bf16.msra.mxu0 %v560_v13  ;;  %v454_v19 = vld [vmem:[%s718_s2] ss:$0 sm:$0xff]  ;;  %v397_v52 = vand.u32 7, %v392_v50 }
   0x8   :  { %508 = vmatpush3.bf16.msra.mxu1 %v553_v6  ;;  %527 = vmatprep.subr.bf16.mxu0 %v574_v0  ;;  %v456_v29 = vld [vmem:[%s719_s4] ss:$0 sm:$0xff] }
   0x9   :  { %509 = vmatprep.subr.bf16.mxu1 %v574_v0  ;;  %v465_v37 = vld [vmem:[%s720_s6] ss:$0 sm:$0xff]  ;;  %vm405_vm3 = vcmp.eq.s32.totalorder %v390_v51, %v397_v52 }
   0xb   :  { %528 = vmatpush3.bf16.msra.mxu0 %v561_v14 }
   0xc   :  { %510 = vmatpush3.bf16.msra.mxu1 %v554_v7  ;;  %529 = vmatprep.subr.bf16.mxu0 %v574_v0  ;;  %v434_v7 = vmul.u32 2, %v390_v51 }
   0xd   :  { %511 = vmatprep.subr.bf16.mxu1 %v574_v0 }
   0xf   :  { %530 = vmatpush3.bf16.msra.mxu0 %v562_v15 }
  0x10   :  { %512 = vmatpush3.bf16.msra.mxu1 %v555_v8  ;;  %531 = vmatprep.subr.bf16.mxu0 %v574_v0  ;;  %v475_v8 = vadd.s32 4294967295, %v434_v7 }
  0x11   :  { %513 = vmatprep.subr.bf16.mxu1 %v574_v0 }
  0x13   :  { %532 = vmatpush3.bf16.msra.mxu0 %v563_v16 }
  0x14   :  { %514 = vmatpush3.bf16.msra.mxu1 %v556_v9  ;;  %533 = vmatprep.subr.bf16.mxu0 %v574_v0  ;;  %v436_v9 = vcvt.s32.f32 %v475_v8 }
  0x15   :  { %515 = vmatprep.subr.bf16.mxu1 %v574_v0 }
  0x17   :  { %534 = vmatpush3.bf16.msra.mxu0 %v564_v17 }
  0x18   :  { %516 = vmatpush3.bf16.msra.mxu1 %v557_v10  ;;  %535 = vmatprep.subr.bf16.mxu0 %v574_v0 }
  0x19   :  { %517 = vmatprep.subr.bf16.mxu1 %v574_v0 }
  0x1b   :  { %536 = vmatpush3.bf16.msra.mxu0 %v565_v18 }
  0x1c   :  { %518 = vmatpush3.bf16.msra.mxu1 %v558_v11  ;;  %537 = vmatprep.subr.bf16.mxu0 %v574_v0 }
  0x1d   :  { %519 = vmatprep.subr.bf16.mxu1 %v574_v0 }
  0x1f   :  { %538 = vmatpush3.bf16.msra.mxu0 %v566_v27 }
  0x20   :  { %520 = vmatpush3.bf16.msra.mxu1 %v559_v12  ;;  %539 = vmatprep.subr.bf16.mxu0 %v574_v0 }
  0x21   :  { %545 = vmatprep.subr.mxu1 %v574_v0 }
  0x23   :  { %540 = vmatpush3.bf16.msra.mxu0 %v567_v28 }
  0xd9   :  { %v79_v20 = vpop.f32.mrb[0].mxu0 }
  0xda   :  { %v80_v21 = vadd.f32 %v454_v19, %v79_v20  ;;  %v503_v22 = vpop.f32.mrb[1].mxu0 }
  0xdb   :  { %v82_v23 = vpop.f32.mrb[2].mxu0 }
  0xdc   :  { %v85_v24 = vmax.f32 %v80_v21, 0.0  ;;  %v504_v25 = vpop.f32.mrb[3].mxu0 }
  0xde   :  { %v86_v26 = vpack.c.bf16 %v85_v24, %v85_v24 }
  0xe0   :  { %522 = vmatmul.mubr.bf16.vlgmr.msra.gmra.mrb[0].mxu1 %v86_v26 }
  0xe1   :  { %547 = vmatprep.mubr.msk.f32.mxu1 %vm575_vm1, %v574_v0 }
 0x1b3   :  { %v192_v30 = vpop.f32.mrb[0].mxu1 }
 0x1b4   :  { %v193_v31 = vadd.f32 %v456_v29, %v192_v30  ;;  %v523_v32 = vpop.f32.mrb[1].mxu1 }
 0x1b5   :  { %v195_v33 = vpop.f32.mrb[2].mxu1 }
 0x1b6   :  { %v198_v34 = vmax.f32 %v193_v31, 0.0  ;;  %v524_v35 = vpop.f32.mrb[3].mxu1 }
 0x1b8   :  { %v199_v36 = vpack.c.bf16 %v198_v34, %v198_v34 }
 0x1ba   :  { %542 = vmatmul.mubr.bf16.vlgmr.msra.gmra.mrb[4].mxu0 %v199_v36 }
 0x28d   :  { %v305_v38 = vpop.f32.mrb[4].mxu0 }
 0x28e   :  { %v306_v39 = vadd.f32 %v465_v37, %v305_v38  ;;  %v543_v40 = vpop.f32.mrb[5].mxu0 }
 0x28f   :  { %v308_v41 = vpop.f32.mrb[6].mxu0 }
 0x290   :  { %v544_v42 = vpop.f32.mrb[7].mxu0  ;;  %v311_v43 = vmul.f32 %v306_v39, %v306_v39 }
 0x292   :  { %312 = vadd.xlane.f32.xlu0 %v311_v43 }
 0x31f   :  { %v313_v44 = vpop.xlane.xlu0 %312 }
 0x320   :  { %v314_v45 = vmax.f32 %v313_v44, 1e-24 }
 0x322   :  { %568 = vrsqrt.f32 %v314_v45 }
 0x32c   :  { %v569_v46 = vpop.eup %568 }
 0x32d   :  { %v316_v47 = vmul.f32 %v569_v46, %v306_v39 }
 0x32f   :  { %546 = vmatpush3.xpose.msra.mxu1 %v316_v47 }
 0x332   :  { %548 = vmatmul.mubr.f32.vlgmr.msra.gmra.mrb[4].mxu1 %v316_v47 }
 0x405   :  { %v383_v53 = vpop.f32.mrb[4].mxu1 }
 0x406   :  { %v549_v54 = vpop.f32.mrb[5].mxu1  ;;  %v406_v55 = vsel %vm405_vm3, %v383_v53, 0.0  ;;  %v411_v56 = vmul.f32 14.285714, %v383_v53 }
 0x407   :  { %v408_v57 = vsel %vm407_vm4, %v406_v55, 0.0 }
 0x408   :  { %409 = vadd.xlane.f32.xlu1 %v408_v57  ;;  %v412_v58 = vsel %vm391_vm5, -1e+30, %v411_v56 }
 0x409   :  { %v413_v59 = vsel %vm407_vm4, %v412_v58, -inf }
 0x40a   :  { %414 = vmax.xlane.f32.xlu0 %v413_v59 }
 0x495   :  { %v410_v60 = vpop.xlane.xlu1 %409 }
 0x496   :  { %vm427_vm6 = vcmp.gt.f32.partialorder %v383_v53, %v410_v60  ;;  %v425_v13 = vmul.f32 14.285714, %v410_v60 }
 0x497   :  { %v415_v61 = vpop.xlane.xlu0 %414  ;;  %v474_v62 = vsel %vm427_vm6, 1.0, %v574_v0 }
 0x498   :  { %v416_v63 = vsub.f32 %v412_v58, %v415_v61  ;;  %v430_v1 = vsel %vm391_vm5, 0.0, %v474_v62 }
 0x499   :  { %v431_v2 = vsel %vm407_vm4, %v430_v1, 0.0 }
 0x49a   :  { %v417_v3 = vmul.f32 1.442695, %v416_v63  ;;  %432 = vadd.xlane.f32.xlu0 %v431_v2 }
 0x49c   :  { %570 = vpow2.f32 %v417_v3 }
 0x4a6   :  { %v571_v4 = vpop.eup %570 }
 0x4a7   :  { %v419_v5 = vsel %vm407_vm4, %v571_v4, 0.0 }
 0x4a8   :  { %420 = vadd.xlane.f32.xlu1 %v419_v5 }
 0x527   :  { %v433_v11 = vpop.xlane.xlu0 %432 }
 0x528   :  { %vm437_vm7 = vcmp.lt.f32.partialorder %v433_v11, %v436_v9 }
 0x529   :  { %v476_v16 = vsel %vm437_vm7, 1.0, %v574_v0 }
 0x535   :  { %v421_v6 = vpop.xlane.xlu1 %420 }
 0x536   :  { %572 = vlog2.f32 %v421_v6 }
 0x540   :  { %v573_v10 = vpop.eup %572 }
 0x541   :  { %v423_v12 = vmul.f32 0.6931472, %v573_v10 }
 0x543   :  { %v424_v14 = vadd.f32 %v423_v12, %v415_v61 }
 0x545   :  { %v426_v15 = vsub.f32 %v424_v14, %v425_v13 }
 0x547   :  { %v441_v17 = vsel %vm440_vm8, %v426_v15, %v476_v16 }
 0x548   :  { %v442_v18 = vrot.slane %v441_v17, 4 }
 0x54a   :  { %v443_v19 = vadd.f32 %v442_v18, %v441_v17 }
 0x54c   :  { %v444_v20 = vrot.slane %v443_v19, 2 }
 0x54e   :  { %v445_v21 = vadd.f32 %v444_v20, %v443_v19 }
 0x550   :  { %v446_v22 = vrot.slane %v445_v21, 1 }
 0x552   :  { %v447_v23 = vadd.f32 %v446_v22, %v445_v21 }
 0x554   :  { %v448_v24 = vmul.f32 0.125, %v447_v23 }
 0x556   :  { %449 = vst [vmem:[%s721_s7] sm:$0x1] %v448_v24 }

</bundles_post_ra>
